<compile_context>
chip_gen: v6e
topology: v6e:2x2x1
jax: 0.10.0
libtpu: 0.0.40
codegen_flags: <defaults>
</compile_context>

<pallas_src>
import jax
import jax.numpy as jnp
from jax.experimental import pallas as pl
from jax.experimental.pallas import tpu as pltpu


def swiglu_kernel(x_ref, w1_ref, b1_ref, w2_ref, b2_ref, w3_ref, b3_ref,
                  o_ref, acc_ref):
    h = pl.program_id(1)

    @pl.when(h == 0)
    def _init():
        acc_ref[...] = jnp.zeros_like(acc_ref)

    x = x_ref[...]                                              # (tm, C) bf16
    x1 = jnp.dot(x, w1_ref[...],
                 preferred_element_type=jnp.float32) + b1_ref[0]   # (tm, tH) f32
    x2 = jnp.dot(x, w2_ref[...],
                 preferred_element_type=jnp.float32) + b2_ref[0]   # (tm, tH) f32

    hidden = jax.nn.silu(x1) * x2        # SiLU gate * value, fp32 on VPU/EUP
    # ffn_ln == nn.Identity (subln=False); nn.Dropout is identity in eval mode.

    acc_ref[...] += jnp.dot(hidden.astype(jnp.bfloat16), w3_ref[...],
                            preferred_element_type=jnp.float32)     # (tm, Co)

    @pl.when(h == pl.num_programs(1) - 1)
    def _finalize():
        o_ref[...] = (acc_ref[...] + b3_ref[0]).astype(o_ref.dtype)


def _spec(shape, index_map, nbuf=2):
    """BlockSpec with explicit buffer count; falls back if kwarg unsupported."""
    try:
        return pl.BlockSpec(shape, index_map, pipeline_mode=pl.Buffered(nbuf))
    except TypeError:  # older jax without pipeline_mode kwarg
        return pl.BlockSpec(shape, index_map)


def _pick_row_tile(M, block_rows):
    tm = min(block_rows, M)
    # v7x shards the "parallel" row axis across its 2 TensorCores: keep >= 2
    # grid steps when M allows so neither core idles.
    if pl.cdiv(M, tm) < 2 and M > 8:
        half = (M + 1) // 2
        tm = ((half + 7) // 8) * 8            # multiple of 8 sublanes
    return tm


def _pick_hidden_tile(H, max_th):
    # Tile H only when it is large and a lane-dense (multiple of 128) divisor
    # exists, so every weight slab stays aligned and the reduction has no
    # out-of-bounds tail.
    if H <= max_th or H % 128 != 0:
        return H
    th = (max_th // 128) * 128
    while th > 128 and H % th != 0:
        th -= 128
    return max(th, 128)


def swiglu_forward(x, params, *, block_rows=512, hidden_block=2048):
    """x: (..., C_in). params: bf16 pre-transposed weights, fp32 biases."""
    C = x.shape[-1]
    H = params["w1"].shape[1]
    Co = params["w3"].shape[1]
    out_dtype = x.dtype
    out_isize = jnp.dtype(out_dtype).itemsize

    # bf16 activations in HBM: halves x DMA bytes and its double-buffer VMEM.
    x2d = x.reshape(-1, C).astype(jnp.bfloat16)
    M = x2d.shape[0]

    tm = _pick_row_tile(M, block_rows)
    tH = _pick_hidden_tile(H, hidden_block)
    n_rows = pl.cdiv(M, tm)       # partial tail block is clipped (rows independent)
    n_h = H // tH
    grid = (n_rows, n_h)

    # Weights constant across the whole grid -> single-buffer them (halves VMEM).
    # When H is tiled they stream along the last grid axis -> keep double-buffer.
    w_bufs = 1 if n_h == 1 else 2

    in_specs = [
        pl.BlockSpec((tm, C), lambda i, h: (i, 0)),                 # x row tile
        _spec((C, tH), lambda i, h: (0, h), w_bufs),                # w1 (bf16, pre-T)
        _spec((1, tH), lambda i, h: (0, h), w_bufs),                # b1 (f32)
        _spec((C, tH), lambda i, h: (0, h), w_bufs),                # w2 (bf16, pre-T)
        _spec((1, tH), lambda i, h: (0, h), w_bufs),                # b2 (f32)
        _spec((tH, Co), lambda i, h: (h, 0), w_bufs),               # w3 (bf16, pre-T)
        _spec((1, Co), lambda i, h: (0, 0), 1),                     # b3 (f32, const)
    ]

    # VMEM budget (no double counting): buffers + resident weights + live fp32.
    vmem_needed = (
        2 * tm * C * 2                              # x tile, 2 bufs, bf16
        + 2 * tm * Co * out_isize                   # out tile, 2 bufs
        + w_bufs * (2 * C * tH + tH * Co) * 2       # w1/w2/w3 slabs, bf16
        + w_bufs * (2 * tH) * 4 + Co * 4            # biases, f32
        + tm * Co * 4                               # f32 accumulator scratch
        + 3 * tm * tH * 4                           # x1/x2/hidden f32 live values
    )
    try:
        phys_vmem = pltpu.get_tpu_info().vmem_capacity_bytes   # 64 MiB/TC on v7x
    except Exception:
        phys_vmem = 64 * 1024 * 1024                            # conservative
    vmem_limit = int(min(0.9 * phys_vmem,
                         max(8 * 1024 * 1024, 1.5 * vmem_needed)))

    cost = pl.CostEstimate(
        flops=2 * M * C * H * 2 + 2 * M * H * Co,
        transcendentals=M * H,                      # sigmoid inside SiLU
        bytes_accessed=(M * C * 2 + M * Co * out_isize
                        + (2 * C * H + H * Co) * 2 + (2 * H + Co) * 4),
    )

    out2d = pl.pallas_call(
        swiglu_kernel,
        out_shape=jax.ShapeDtypeStruct((M, Co), out_dtype),
        grid_spec=pltpu.PrefetchScalarGridSpec(
            num_scalar_prefetch=0,
            grid=grid,
            in_specs=in_specs,
            out_specs=pl.BlockSpec((tm, Co), lambda i, h: (i, 0)),
            scratch_shapes=[pltpu.VMEM((tm, Co), jnp.float32)],
        ),
        compiler_params=pltpu.CompilerParams(
            dimension_semantics=("parallel", "arbitrary"),
            vmem_limit_bytes=vmem_limit),
        cost_estimate=cost,
    )(x2d, params["w1"], params["b1"], params["w2"], params["b2"],
      params["w3"], params["b3"])

    return out2d.reshape(*x.shape[:-1], Co)


def swiglu_reference(x, params):
    """Pure-JAX fp32 reference replicating the PyTorch forward (eval mode)."""
    w1 = params["w1"].astype(jnp.float32)
    w2 = params["w2"].astype(jnp.float32)
    w3 = params["w3"].astype(jnp.float32)
    x1 = x @ w1 + params["b1"][0]
    x2 = x @ w2 + params["b2"][0]
    hidden = jax.nn.silu(x1) * x2            # ffn_ln = Identity, dropout = id
    return hidden @ w3 + params["b3"][0]


def init_params(key, in_features, hidden_features=None, out_features=None):
    # NOTE: for real deployments keep C / H / Co multiples of 128 (lane-dense);
    # toy sizes below rely on block_shape == full array dims being allowed.
    hidden_features = hidden_features or in_features
    out_features = out_features or in_features
    ks = jax.random.split(key, 6)
    s = 0.1
    f32 = jnp.float32
    return {
        # weights stored pre-transposed (y = x @ W) and in bf16 for the MXU
        "w1": (s * jax.random.normal(ks[0], (in_features, hidden_features), f32)
               ).astype(jnp.bfloat16),
        "b1": s * jax.random.normal(ks[1], (1, hidden_features), f32),
        "w2": (s * jax.random.normal(ks[2], (in_features, hidden_features), f32)
               ).astype(jnp.bfloat16),
        "b2": s * jax.random.normal(ks[3], (1, hidden_features), f32),
        "w3": (s * jax.random.normal(ks[4], (hidden_features, out_features), f32)
               ).astype(jnp.bfloat16),
        "b3": s * jax.random.normal(ks[5], (1, out_features), f32),
    }


if __name__ == "__main__":
    B, N, C, H = 2, 8, 32, 64        # batch, tokens, in_features, hidden_features
    key = jax.random.PRNGKey(0)
    kx, kp = jax.random.split(key)
    x = jax.random.normal(kx, (B, N, C), jnp.float32)
    params = init_params(kp, C, H)   # out_features defaults to in_features

    out = swiglu_forward(x, params)
    out = jax.block_until_ready(out)

    ref = swiglu_reference(x, params)
    assert out.shape == ref.shape == (B, N, C)
    err = jnp.max(jnp.abs(out - ref))
    # bf16 MXU operands / bf16 activations vs fp32 reference -> relaxed tolerance
    assert jnp.allclose(out, ref, atol=2e-2, rtol=2e-2), f"max err {err}"
    print("KERNEL_OK")
</pallas_src>

<mosaic_0001>
module attributes {stable_mosaic.version = 11 : i64} {
  func.func @swiglu_kernel(%arg0: i32, %arg1: i32, %arg2: memref<8x32xbf16, #tpu.memory_space<vmem>>, %arg3: memref<32x64xbf16, #tpu.memory_space<vmem>>, %arg4: memref<1x64xf32, #tpu.memory_space<vmem>>, %arg5: memref<32x64xbf16, #tpu.memory_space<vmem>>, %arg6: memref<1x64xf32, #tpu.memory_space<vmem>>, %arg7: memref<64x32xbf16, #tpu.memory_space<vmem>>, %arg8: memref<1x32xf32, #tpu.memory_space<vmem>>, %arg9: memref<8x32xf32, #tpu.memory_space<vmem>>, %arg10: memref<8x32xf32, #tpu.memory_space<vmem>>) attributes {dimension_semantics = [#tpu.dimension_semantics<parallel>, #tpu.dimension_semantics<arbitrary>], iteration_bounds = array<i64: 2, 1>, scalar_prefetch = 0 : i64, scratch_operands = 1 : i64, tpu.core_type = #tpu.core_type<tc>, window_params = [{transform_indices = @transform_0, window_bounds = array<i64: 8, 32>}, {pipeline_mode = #tpu.pipeline_mode<synchronous>, transform_indices = @transform_1, window_bounds = array<i64: 32, 64>}, {pipeline_mode = #tpu.pipeline_mode<synchronous>, transform_indices = @transform_2, window_bounds = array<i64: 1, 64>}, {pipeline_mode = #tpu.pipeline_mode<synchronous>, transform_indices = @transform_3, window_bounds = array<i64: 32, 64>}, {pipeline_mode = #tpu.pipeline_mode<synchronous>, transform_indices = @transform_4, window_bounds = array<i64: 1, 64>}, {pipeline_mode = #tpu.pipeline_mode<synchronous>, transform_indices = @transform_5, window_bounds = array<i64: 64, 32>}, {pipeline_mode = #tpu.pipeline_mode<synchronous>, transform_indices = @transform_6, window_bounds = array<i64: 1, 32>}, {transform_indices = @transform_7, window_bounds = array<i64: 8, 32>}]} {
    %c0_i32 = arith.constant 0 : i32
    %0 = arith.cmpi eq, %arg1, %c0_i32 : i32
    %1 = arith.extui %0 : i1 to i32
    %c0_i32_0 = arith.constant 0 : i32
    %2 = arith.cmpi ne, %1, %c0_i32_0 : i32
    scf.if %2 {
      %cst_21 = arith.constant 0.000000e+00 : f32
      %34 = vector.broadcast %cst_21 : f32 to vector<8x32xf32>
      %c0_22 = arith.constant 0 : index
      %c0_23 = arith.constant 0 : index
      %35 = vector.load %arg10[%c0_22, %c0_23] : memref<8x32xf32, #tpu.memory_space<vmem>>, vector<8x32xf32>
      tpu.vector_store %arg10[%c0_22, %c0_23], %34 {strides = array<i32>} : memref<8x32xf32, #tpu.memory_space<vmem>>, vector<8x32xf32>,
    } else {
    }
    %c0 = arith.constant 0 : index
    %c0_1 = arith.constant 0 : index
    %3 = vector.load %arg2[%c0, %c0_1] : memref<8x32xbf16, #tpu.memory_space<vmem>>, vector<8x32xbf16>
    %c0_2 = arith.constant 0 : index
    %c0_3 = arith.constant 0 : index
    %4 = vector.load %arg3[%c0_2, %c0_3] : memref<32x64xbf16, #tpu.memory_space<vmem>>, vector<32x64xbf16>
    %cst = arith.constant dense<0.000000e+00> : vector<8x64xf32>
    %5 = tpu.matmul %3, %4, %cst {dimension_numbers = #tpu.dot_dimension_numbers<[1], [0], [0], [1], [0, 0, 1, 1], [], []>} : vector<8x32xbf16>, vector<32x64xbf16>, vector<8x64xf32> -> vector<8x64xf32>
    %c0_4 = arith.constant 0 : index
    %c0_5 = arith.constant 0 : index
    %6 = vector.load %arg4[%c0_4, %c0_5] : memref<1x64xf32, #tpu.memory_space<vmem>>, vector<1x64xf32>
    %7 = vector.shape_cast %6 : vector<1x64xf32> to vector<64xf32>
    %8 = vector.shape_cast %7 : vector<64xf32> to vector<1x64xf32>
    %9 = vector.broadcast %8 : vector<1x64xf32> to vector<8x64xf32>
    %10 = arith.addf %5, %9 : vector<8x64xf32>
    %c0_6 = arith.constant 0 : index
    %c0_7 = arith.constant 0 : index
    %11 = vector.load %arg5[%c0_6, %c0_7] : memref<32x64xbf16, #tpu.memory_space<vmem>>, vector<32x64xbf16>
    %cst_8 = arith.constant dense<0.000000e+00> : vector<8x64xf32>
    %12 = tpu.matmul %3, %11, %cst_8 {dimension_numbers = #tpu.dot_dimension_numbers<[1], [0], [0], [1], [0, 0, 1, 1], [], []>} : vector<8x32xbf16>, vector<32x64xbf16>, vector<8x64xf32> -> vector<8x64xf32>
    %c0_9 = arith.constant 0 : index
    %c0_10 = arith.constant 0 : index
    %13 = vector.load %arg6[%c0_9, %c0_10] : memref<1x64xf32, #tpu.memory_space<vmem>>, vector<1x64xf32>
    %14 = vector.shape_cast %13 : vector<1x64xf32> to vector<64xf32>
    %15 = vector.shape_cast %14 : vector<64xf32> to vector<1x64xf32>
    %16 = vector.broadcast %15 : vector<1x64xf32> to vector<8x64xf32>
    %17 = arith.addf %12, %16 : vector<8x64xf32>
    %18 = arith.negf %10 : vector<8x64xf32>
    %19 = math.exp %18 : vector<8x64xf32>
    %cst_11 = arith.constant 1.000000e+00 : f32
    %20 = vector.broadcast %cst_11 : f32 to vector<8x64xf32>
    %21 = arith.addf %20, %19 : vector<8x64xf32>
    %22 = arith.divf %20, %21 : vector<8x64xf32>
    %23 = arith.mulf %10, %22 : vector<8x64xf32>
    %24 = arith.mulf %23, %17 : vector<8x64xf32>
    %c0_12 = arith.constant 0 : index
    %c0_13 = arith.constant 0 : index
    %25 = vector.load %arg10[%c0_12, %c0_13] : memref<8x32xf32, #tpu.memory_space<vmem>>, vector<8x32xf32>
    %26 = arith.truncf %24 : vector<8x64xf32> to vector<8x64xbf16>
    %c0_14 = arith.constant 0 : index
    %c0_15 = arith.constant 0 : index
    %27 = vector.load %arg7[%c0_14, %c0_15] : memref<64x32xbf16, #tpu.memory_space<vmem>>, vector<64x32xbf16>
    %cst_16 = arith.constant dense<0.000000e+00> : vector<8x32xf32>
    %28 = tpu.matmul %26, %27, %cst_16 {dimension_numbers = #tpu.dot_dimension_numbers<[1], [0], [0], [1], [0, 0, 1, 1], [], []>} : vector<8x64xbf16>, vector<64x32xbf16>, vector<8x32xf32> -> vector<8x32xf32>
    %29 = arith.addf %25, %28 : vector<8x32xf32>
    %c0_17 = arith.constant 0 : index
    %c0_18 = arith.constant 0 : index
    %30 = vector.load %arg10[%c0_17, %c0_18] : memref<8x32xf32, #tpu.memory_space<vmem>>, vector<8x32xf32>
    tpu.vector_store %arg10[%c0_17, %c0_18], %29 {strides = array<i32>} : memref<8x32xf32, #tpu.memory_space<vmem>>, vector<8x32xf32>,
    %c0_i32_19 = arith.constant 0 : i32
    %31 = arith.cmpi eq, %arg1, %c0_i32_19 : i32
    %32 = arith.extui %31 : i1 to i32
    %c0_i32_20 = arith.constant 0 : i32
    %33 = arith.cmpi ne, %32, %c0_i32_20 : i32
    scf.if %33 {
      %c0_21 = arith.constant 0 : index
      %c0_22 = arith.constant 0 : index
      %34 = vector.load %arg10[%c0_21, %c0_22] : memref<8x32xf32, #tpu.memory_space<vmem>>, vector<8x32xf32>
      %c0_23 = arith.constant 0 : index
      %c0_24 = arith.constant 0 : index
      %35 = vector.load %arg8[%c0_23, %c0_24] : memref<1x32xf32, #tpu.memory_space<vmem>>, vector<1x32xf32>
      %36 = vector.shape_cast %35 : vector<1x32xf32> to vector<32xf32>
      %37 = vector.shape_cast %36 : vector<32xf32> to vector<1x32xf32>
      %38 = vector.broadcast %37 : vector<1x32xf32> to vector<8x32xf32>
      %39 = arith.addf %34, %38 : vector<8x32xf32>
      %c0_25 = arith.constant 0 : index
      %c0_26 = arith.constant 0 : index
      %40 = vector.load %arg9[%c0_25, %c0_26] : memref<8x32xf32, #tpu.memory_space<vmem>>, vector<8x32xf32>
      tpu.vector_store %arg9[%c0_25, %c0_26], %39 {strides = array<i32>} : memref<8x32xf32, #tpu.memory_space<vmem>>, vector<8x32xf32>,
    } else {
    }
    return
  }
  func.func @transform_0(%arg0: i32, %arg1: i32) -> (i32, i32) {
    %c0_i32 = arith.constant 0 : i32
    %c0_i32_0 = arith.constant 0 : i32
    return %arg0, %c0_i32 : i32, i32
  }
  func.func @transform_1(%arg0: i32, %arg1: i32) -> (i32, i32) {
    %c0_i32 = arith.constant 0 : i32
    %c0_i32_0 = arith.constant 0 : i32
    return %c0_i32, %arg1 : i32, i32
  }
  func.func @transform_2(%arg0: i32, %arg1: i32) -> (i32, i32) {
    %c0_i32 = arith.constant 0 : i32
    %c0_i32_0 = arith.constant 0 : i32
    return %c0_i32, %arg1 : i32, i32
  }
  func.func @transform_3(%arg0: i32, %arg1: i32) -> (i32, i32) {
    %c0_i32 = arith.constant 0 : i32
    %c0_i32_0 = arith.constant 0 : i32
    return %c0_i32, %arg1 : i32, i32
  }
  func.func @transform_4(%arg0: i32, %arg1: i32) -> (i32, i32) {
    %c0_i32 = arith.constant 0 : i32
    %c0_i32_0 = arith.constant 0 : i32
    return %c0_i32, %arg1 : i32, i32
  }
  func.func @transform_5(%arg0: i32, %arg1: i32) -> (i32, i32) {
    %c0_i32 = arith.constant 0 : i32
    %c0_i32_0 = arith.constant 0 : i32
    return %arg1, %c0_i32 : i32, i32
  }
  func.func @transform_6(%arg0: i32, %arg1: i32) -> (i32, i32) {
    %c0_i32 = arith.constant 0 : i32
    %c0_i32_0 = arith.constant 0 : i32
    %c0_i32_1 = arith.constant 0 : i32
    return %c0_i32, %c0_i32_0 : i32, i32
  }
  func.func @transform_7(%arg0: i32, %arg1: i32) -> (i32, i32) {
    %c0_i32 = arith.constant 0 : i32
    %c0_i32_0 = arith.constant 0 : i32
    return %arg0, %c0_i32 : i32, i32
  }
}

</mosaic_0001>

<bundles_post_ra>
// kernel: tpu_custom_call.1
= control target key start
LH: loop header
LB: loop body
LE: loop exit
PB: predicated region body
PF: predicated region fallthrough
CT: control target
= control target key end

     0   :  { %12 = vsyncpa [#allocation4], 0  ;;  %s1159_s0 = inlined_call_operand.vmem [shape: bf16[16,32], index: 0, kind: input, shape index: {}]   ;;  %s1160_s1 = inlined_call_operand.vmem [shape: bf16[32,64], index: 1, kind: input, shape index: {}]   ;;  %s1161_s2 = inlined_call_operand.vmem [shape: f32[1,64], index: 2, kind: input, shape index: {}]   ;;  %s1162_s3 = inlined_call_operand.vmem [shape: bf16[32,64], index: 3, kind: input, shape index: {}]   ;;  %s1163_s4 = inlined_call_operand.vmem [shape: f32[1,64], index: 4, kind: input, shape index: {}]   ;;  %s1164_s5 = inlined_call_operand.vmem [shape: bf16[64,32], index: 5, kind: input, shape index: {}]   ;;  %s1165_s6 = inlined_call_operand.vmem [shape: f32[1,32], index: 6, kind: input, shape index: {}]   ;;  %s1166_s7 = inlined_call_operand.hbm [shape: f32[16,32], index: 7, kind: output, shape index: {}]  }
   0x1   :  { %14 = vsyncpa [#allocation4 + $0x1], 0  ;;  %s1019_s24 = smov 0   ;;  %s1021_s25 = smov 0  }
   0x2   :  { %s1023_s26 = smov 0   ;;  %s1025_s27 = smov 0  }
   0x3   :  { %s1027_s28 = smov 0   ;;  %s1029_s29 = smov 0  }
   0x4 LB: > { %s759_s30 = sadd.s32 4294967295, %s974_s29   ;;  %s760_s8 = sadd.s32 4294967294, %s974_s29   ;;  %s974_s29 = sphi %s1029_s29, %s20_s29   ;;  %s970_s28 = sphi %s1027_s28, %s1173_s28   ;;  %s966_s27 = sphi %s1025_s27, %s1172_s27   ;;  %s962_s26 = sphi %s1023_s26, %s1171_s26   ;;  %s958_s25 = sphi %s1021_s25, %s1170_s25   ;;  %s954_s24 = sphi %s1019_s24, %s1169_s24  }
   0x5   : > { %s32_s9 = sadd.s32 1, %s970_s28  ;;  %s216_s10 = sadd.s32 1, %s962_s26 }
   0x6   : > { %p34_p0 = scmp.ge.s32.totalorder %s32_s9, 2  ;;  %p226_p1 = scmp.ne.s32.totalorder %s962_s26, %s958_s25 }
   0x7   : > { %p227_p2 = scmp.eq.s32.totalorder %s759_s30, 1  ;;  %p232_p3 = scmp.ne.s32.totalorder %s958_s25, %s954_s24 }
   0x8   : > { %s1175_s9 = smov (%p34_p0, %s32_s9), 0  ;;  %p233_p5 = scmp.eq.s32.totalorder %s760_s8, 1 }
   0x9   : > { %p1059_p4 = por %p227_p2, %p226_p1  ;;  %s213_s12 = ssub.s32 %s970_s28, %s1175_s9 }
   0xa   : > { %p768_p6 = scmp.ge.s32.totalorder %s974_s29, 1  ;;  %p214_p7 = scmp.eq.s32.totalorder %s213_s12, 0 }
   0xb   : > { %p1066_p8 = por %p233_p5, %p232_p3  ;;  %p296_p9 = scmp.lt.s32.totalorder %s974_s29, 3 }
   0xc   : > { %s1072_s14 = scalar_select %p214_p7, %s962_s26, %s216_s10  }
   0xd   : > { %p297_p10 = pnand %p768_p6, %p296_p9 }
   0xe   : > { %p346_p11 = scmp.lt.s32.totalorder (!%p297_p10), %s966_s27, 1  ;;  %s343_s12 = sand.u32 (!%p297_p10), 1, %s958_s25  }
   0xf   : > { %300 = sbr.rel (%p297_p10) target bundleno = 480 (0x1e0), region = 48  ;;  %s769_s15 = sshll.u32 (!%p297_p10), %s343_s12, 3 }
  0x10   : > { %s787_s18 = sshll.u32 (!%p297_p10), %s966_s27, 7  ;;  %s610_s30 = scalar_lea.sflag (!%p297_p10), [#allocation4], %s343_s12 }
  0x11   : > { %s621_s23 = scalar_lea.hbm (!%p297_p10), %s1166_s7, %s787_s18  ;;  %s978_s10 = smov (!%p297_p10), [#allocation3]  }
  0x12   : > { %s902_s16 = sshll.u32 (!%p297_p10), %s978_s10, 4  ;;  %s903_s16 = int_to_ptr.vmem [resolvable:$false] %s902_s16 }
  0x14   : > { %v886_v0 = vld [vmem:[%s1160_s1 + $0x8] sm:$0xff]   ;;  %v976_v1 = vmov 0.0   ;;  %v887_v2 = vld [vmem:[%s1160_s1] sm:$0xff]   ;;  %vm977_vm0 = vmmov 0   ;;  %vm375_vm1 = vcmask 261120   ;;  %s347_s19 = scalar_select %p346_p11, %s966_s27, 1 }
  0x15   : > { %801 = vmatprep.subr.bf16.mxu1 %v976_v1  ;;  %817 = vmatprep.subr.bf16.mxu0 %v976_v1  ;;  %376 = vst.msk [vmem:[#allocation2] sm:$0xff] %vm375_vm1, %v976_v1  ;;  %v888_v3 = vld [vmem:[%s1162_s3 + $0x8] sm:$0xff]   ;;  %v889_v5 = vld [vmem:[%s1162_s3] sm:$0xff]   ;;  %v890_v6 = vld [vmem:[%s1164_s5 + $0x18] sm:$0xff]   ;;  %vm550_vm2 = vcmask 523264   ;;  %s904_s27 = scalar_lea.vmem %s903_s16, 256 }
  0x16   : > { %802 = vmatpush3.bf16.msra.mxu1 %v886_v0  ;;  %805 = vmatprep.mubr.msk.bf16.mxu1 %vm977_vm0, %v976_v1  ;;  %s770_s20 = sshll.u32 %s347_s19, 2  ;;  %v891_v7 = vld [vmem:[%s1164_s5 + $0x10] sm:$0xff]   ;;  %v892_v8 = vld [vmem:[%s1164_s5 + $0x8] sm:$0xff]   ;;  %v893_v9 = vld [vmem:[%s1164_s5] sm:$0xff]   ;;  %s345_s19 = scalar_lea.vmem [#allocation3], %s769_s15 }
  0x17   : > { %803 = vmatprep.subr.bf16.mxu1 %v976_v1  ;;  %825 = vmatprep.mubr.msk.bf16.mxu0 %vm977_vm0, %v976_v1  ;;  %s349_s8 = scalar_lea.vmem %s1159_s0, %s770_s20  ;;  %v771_v10 = vld [vmem:[%s1161_s2] ss:$0 sm:$0xff]  ;;  %s623_s20 = sshll.u32 %s345_s19, 4  ;;  %s624_s20 = int_to_ptr.vmem [resolvable:$true] %s623_s20 }
  0x18   : > { %v377_v4 = vld [vmem:[%s349_s8] sm:$0xf]  ;;  %818 = vmatpush3.bf16.msra.mxu0 %v890_v6  ;;  %s898_s8 = scalar_lea.vmem %s624_s20, 128  ;;  %p905_p1 = scmp.lt.s32.totalorder %s624_s20, %s903_s16 }
  0x19   : > { %819 = vmatprep.subr.bf16.mxu0 %v976_v1  ;;  %v775_v23 = vld [vmem:[%s1163_s4] ss:$0 sm:$0xff]  ;;  %p899_p12 = scmp.ne.s32.totalorder %s624_s20, %s898_s8  ;;  %p906_p2 = scmp.lt.s32.totalorder %s904_s27, %s898_s8 }
  0x1a   : > { %804 = vmatpush3.bf16.msra.mxu1 %v887_v2  ;;  %v785_v35 = vld [vmem:[%s1165_s6] ss:$0 sm:$0xff] }
  0x1b   : > { %809 = vmatprep.subr.bf16.mxu1 %v976_v1  ;;  %p900_p13 = pnand %p899_p12, %p1059_p4  ;;  %p907_p3 = por %p906_p2, %p905_p1 }
  0x1c   : > { %820 = vmatpush3.bf16.msra.mxu0 %v891_v7  ;;  %v516_v29 = vld [vmem:[#allocation2] sm:$0xff] }
  0x1d   : > { %806 = vmatmul.mubr.msk.bf16.vlgmr.msra.gmra.mxu1 %vm375_vm1, %v377_v4  ;;  %821 = vmatprep.subr.bf16.mxu0 %v976_v1  ;;  %p901_p0 = pneg %p900_p13 }
  0x1e   : > { %810 = vmatpush3.bf16.msra.mxu1 %v888_v3  ;;  %813 = vmatprep.mubr.msk.bf16.mxu1 %vm977_vm0, %v976_v1 }
  0x1f   : > { %811 = vmatprep.subr.bf16.mxu1 %v976_v1  ;;  %p908_p5 = pnand %p907_p3, %p901_p0 }
  0x20   : > { %822 = vmatpush3.bf16.msra.mxu0 %v892_v8 }
  0x21   : > { %823 = vmatprep.subr.bf16.mxu0 %v976_v1 }
  0x22   : > { %812 = vmatpush3.bf16.msra.mxu1 %v889_v5 }
  0x24   : > { %824 = vmatpush3.bf16.msra.mxu0 %v893_v9 }
  0x25   : > { %814 = vmatmul.mubr.msk.bf16.vlgmr.msra.gmra.mxu1 %vm375_vm1, %v377_v4 }
  0xdd   : > { %v439_v11 = vpop.f32.mrf.mxu1 }
  0xde   : > { %v440_v12 = vadd.f32 %v771_v10, %v439_v11 }
  0xdf   : > { %v807_v13 = vpop.f32.mrf.mxu1 }
  0xe0   : > { %v779_v14 = vmul.f32 -1.442695, %v440_v12 }
  0xe1   : > { %v442_v15 = vpop.f32.mrf.mxu1 }
  0xe2   : > { %894 = vpow2.f32 %v779_v14 }
  0xe3   : > { %v808_v16 = vpop.f32.mrf.mxu1 }
  0xe5   : > { %v502_v17 = vpop.f32.mrf.mxu1 }
  0xe6   : > { %v503_v24 = vadd.f32 %v775_v23, %v502_v17 }
  0xe7   : > { %v815_v18 = vpop.f32.mrf.mxu1 }
  0xe9   : > { %v505_v19 = vpop.f32.mrf.mxu1 }
  0xeb   : > { %v816_v20 = vpop.f32.mrf.mxu1 }
  0xef   : > { %v895_v21 = vpop.eup %894 }
  0xf0   : > { %v511_v22 = vadd.f32 1.0, %v895_v21 }
  0xf2   : > { %896 = vrcp.f32 %v511_v22 }
  0xff   : > { %v897_v25 = vpop.eup %896 }
 0x100   : > { %v514_v26 = vmul.f32 %v897_v25, %v440_v12 }
 0x102   : > { %v515_v27 = vmul.f32 %v514_v26, %v503_v24 }
 0x104   : > { %v517_v28 = vpack.c.bf16 %v515_v27, %v515_v27 }
 0x106   : > { %826 = vmatmul.mubr.msk.bf16.vlgmr.msra.gmra.mxu0 %vm550_vm2, %v517_v28 }
 0x1c6   : > { %v588_v30 = vpop.f32.mrf.mxu0 }
 0x1c7   : > { %v594_v31 = vadd.f32 %v588_v30, %v516_v29 }
 0x1c8   : > { %v827_v32 = vpop.f32.mrf.mxu0 }
 0x1c9   : > { %595 = vst.msk [vmem:[#allocation2] sm:$0xff] %vm375_vm1, %v594_v31 }
 0x1ca   : > { %v591_v33 = vpop.f32.mrf.mxu0 }
 0x1cc   : > { %v828_v34 = vpop.f32.mrf.mxu0 }
 0x1d0   : > { %v599_v36 = vld [vmem:[#allocation2] sm:$0xff] }
 0x1d1   : > { %v607_v37 = vadd.f32 %v785_v35, %v599_v36 }
 0x1d3   : > { %608 = vst.msk [vmem:[%s345_s19] sm:$0xff] %vm375_vm1, %v607_v37 }
 0x1d4   : > { %911 = shalt.err (!%p908_p5)
}
 0x1d5   : > { %s912_s15 = scalar_lea.hbm %s621_s23, 128  ;;  %s916_s18 = scalar_lea.hbm %s1166_s7, 256 }
 0x1d6   : > { %p913_p6 = scmp.ne.s32.totalorder %s621_s23, %s912_s15  ;;  %p917_p10 = scmp.lt.s32.totalorder %s621_s23, %s1166_s7 }
 0x1d7   : > { %p918_p11 = scmp.lt.s32.totalorder %s916_s18, %s912_s15 }
 0x1d8   : > { %p914_p7 = pnand %p913_p6, %p1059_p4 }
 0x1d9   : > { %p919_p12 = por %p918_p11, %p917_p10 }
 0x1da   : > { %p915_p9 = pneg %p914_p7 }
 0x1dc   : > { %p920_p13 = pnand %p919_p12, %p915_p9 }
 0x1de   : > { %923 = shalt.err (!%p920_p13)
}
 0x1df   : > { %829 = dma.vmem_to_hbm [thread:$0]  (%p1059_p4), %s624_s20, 128, %s621_s23, %s610_s30  }
 0x1e0 PF: > { %p835_p0 = scmp.ge.s32.totalorder %s974_s29, 2  ;;  %s635_s22 = sand.u32 1, %s954_s24  }
 0x1e1   : > { %s636_s8 = scalar_lea.sflag [#allocation4], %s635_s22 }
 0x1e2   : > { %p832_p1 = pnand %p835_p0, %p1066_p8 }
 0x1e4   : > { %p833_p2 = pneg %p832_p1 }
 0x1e6   : > { %949 = dma.done.wait (%p833_p2), %s636_s8, 128  }
 0x1e7   : > { %951 = vsyncadd (%p833_p2), %s636_s8, 4294967168  ;;  %s20_s29 = sadd.s32 1, %s974_s29   ;;  %s1169_s24 = smov %s958_s25 }
 0x1e8   : > { %p17_p3 = scmp.ge.s32.totalorder %s20_s29, 4   ;;  %s1170_s25 = smov %s962_s26 }
 0x1e9   : > { %s1171_s26 = smov %s1072_s14  ;;  %s1172_s27 = smov %s970_s28 }
 0x1ea   : > { %s1173_s28 = smov %s1175_s9  ;;  %19 = sbr.rel (!%p17_p3) target bundleno = 4 (0x4), region = 106 }
 0x1ef   :  { %641 = vsyncpa [#allocation4], 1 }
 0x1f0   :  { %643 = vsyncpa [#allocation4 + $0x1], 1 }

</bundles_post_ra>
